<compile_context>
chip_gen: v7x
topology: tpu7x:2x2x1
jax: 0.10.0
libtpu: 0.0.40
codegen_flags: <defaults>
</compile_context>

<pallas_src>
import jax
import jax.numpy as jnp
from jax.experimental import pallas as pl
from jax.experimental.pallas import tpu as pltpu

# ---- problem sizes (small, consistent with the module) ----
INPUT_DIM = 8
HIDDEN = 128                      # fixed by the module (Linear(in,128), Linear(128,128))
LIFT_DIM = 120                    # lifting_dim; INPUT_DIM + LIFT_DIM = 128 -> lane-dense output
OUT_DIM = INPUT_DIM + LIFT_DIM    # 128
assert OUT_DIM == HIDDEN, "packing layout assumes input_dim + lifting_dim == 128"

WPACK_ROWS = ((INPUT_DIM + 3 + 7) // 8) * 8   # 16: w1 rows + 3 bias rows, 8-aligned


def _round_up(n, m):
    return ((n + m - 1) // m) * m


def _lls_encode_kernel(x_ref, wpack_ref, w23_ref, out_ref):
    """Fused encoder + concat for one row tile.

    x     : (tile_m, INPUT_DIM)          f32
    wpack : (16, 128)                    rows 0..7 = w1^T, row 8 = b1, row 9 = b2,
                                         row 10 = b3 (zero-padded to 128, lanes 0..7 zero)
    w23   : (2, 128, 128)                [0] = w2^T, [1] = w3^T zero-padded (cols 0..7 zero)
    out   : (tile_m, 128)  == concat([x, encode(x)], -1)
    """
    x = x_ref[...]                                       # (tile_m, INPUT_DIM)

    w1 = wpack_ref[0:INPUT_DIM, :]                       # (INPUT_DIM, HIDDEN) static tile-aligned view
    b1 = wpack_ref[pl.ds(INPUT_DIM, 1), :]               # (1, HIDDEN)
    b2 = wpack_ref[pl.ds(INPUT_DIM + 1, 1), :]           # (1, HIDDEN)
    b3 = wpack_ref[pl.ds(INPUT_DIM + 2, 1), :]           # (1, OUT_DIM), lanes 0..7 exactly 0
    w2 = w23_ref[0]                                      # (HIDDEN, HIDDEN)
    w3 = w23_ref[1]                                      # (HIDDEN, OUT_DIM), cols 0..7 exactly 0

    h1 = jnp.maximum(
        jnp.dot(x, w1, preferred_element_type=jnp.float32) + b1, 0.0)
    h2 = jnp.maximum(
        jnp.dot(h1, w2, preferred_element_type=jnp.float32) + b2, 0.0)
    e = jnp.maximum(
        jnp.dot(h2, w3, preferred_element_type=jnp.float32) + b3, 0.0)
    # e lanes 0..INPUT_DIM-1 are exact zeros (zero weight cols, zero bias, ReLU(0)=0),
    # so a single lane-dense 128-wide store finishes the concat:
    x_pad = jnp.concatenate(
        [x, jnp.zeros((x.shape[0], OUT_DIM - INPUT_DIM), x.dtype)], axis=-1)
    out_ref[...] = x_pad + e


def lls_no_decoder_forward(x, kernel_params, *, tile_m=256):
    """z = concat([x, encode_net(x)], -1) via one gridded pallas_call.

    Weights are VMEM-resident across grid steps (constant index_maps); row
    tiles of up to `tile_m` rows per step, row axis marked "parallel".
    """
    wpack, w23 = kernel_params
    n, d = x.shape
    assert d == INPUT_DIM
    tile_m = min(tile_m, _round_up(n, 8))
    n_pad = _round_up(n, tile_m)
    x_in = jnp.pad(x, ((0, n_pad - n), (0, 0))) if n_pad != n else x
    grid = (n_pad // tile_m,)

    flops = 2 * n_pad * (INPUT_DIM * HIDDEN + HIDDEN * HIDDEN + HIDDEN * OUT_DIM)
    bytes_accessed = 4 * (x_in.size + wpack.size + w23.size + n_pad * OUT_DIM)

    out = pl.pallas_call(
        _lls_encode_kernel,
        out_shape=jax.ShapeDtypeStruct((n_pad, OUT_DIM), jnp.float32),
        grid_spec=pltpu.PrefetchScalarGridSpec(
            num_scalar_prefetch=0,
            grid=grid,
            in_specs=[
                pl.BlockSpec((tile_m, INPUT_DIM), lambda i: (i, 0)),
                pl.BlockSpec((WPACK_ROWS, HIDDEN), lambda i: (0, 0)),       # resident
                pl.BlockSpec((2, HIDDEN, OUT_DIM), lambda i: (0, 0, 0)),    # resident
            ],
            out_specs=pl.BlockSpec((tile_m, OUT_DIM), lambda i: (i, 0)),
        ),
        compiler_params=pltpu.CompilerParams(dimension_semantics=("parallel",)),
        cost_estimate=pl.CostEstimate(
            flops=flops, transcendentals=0, bytes_accessed=bytes_accessed),
    )(x_in, wpack, w23)
    return out[:n] if n_pad != n else out


# ---------------- wrapper-side (one-time) weight preprocessing ----------------

def _spectral_sigma(w, n_iter=30):
    """Largest singular value via power iteration (what torch's SN estimates)."""
    # TODO(synk): torch.nn.utils.spectral_norm keeps a running u/v with one
    # iteration per training step; when loading torch checkpoints, divide by
    # torch's stored sigma for bitwise fidelity.
    v = jnp.ones((w.shape[1],), w.dtype) / jnp.sqrt(jnp.float32(w.shape[1]))

    def body(_, v):
        u = w @ v
        u = u / (jnp.linalg.norm(u) + 1e-12)
        v = w.T @ u
        v = v / (jnp.linalg.norm(v) + 1e-12)
        return v

    v = jax.lax.fori_loop(0, n_iter, body, v)
    u = w @ v
    u = u / (jnp.linalg.norm(u) + 1e-12)
    return u @ (w @ v)


def make_params(key):
    ks = jax.random.split(key, 6)
    # raw weights in PyTorch (out_features, in_features) layout
    w1 = jax.random.normal(ks[0], (HIDDEN, INPUT_DIM), jnp.float32) * 0.1
    b1 = jax.random.normal(ks[1], (HIDDEN,), jnp.float32) * 0.1
    w2 = jax.random.normal(ks[2], (HIDDEN, HIDDEN), jnp.float32) * 0.1
    b2 = jax.random.normal(ks[3], (HIDDEN,), jnp.float32) * 0.1
    w3 = jax.random.normal(ks[4], (LIFT_DIM, HIDDEN), jnp.float32) * 0.1
    b3 = jax.random.normal(ks[5], (LIFT_DIM,), jnp.float32) * 0.1

    # spectral_norm(Linear).forward uses W / sigma_max(W); apply once, then
    # pre-transpose so the kernel needs no in-kernel .T.
    w1t = (w1 / _spectral_sigma(w1)).T          # (INPUT_DIM, HIDDEN)
    w2t = (w2 / _spectral_sigma(w2)).T          # (HIDDEN, HIDDEN)
    w3t = (w3 / _spectral_sigma(w3)).T          # (HIDDEN, LIFT_DIM)

    # Zero-pad layer-3 to full OUT_DIM output width with real columns at lanes
    # INPUT_DIM..OUT_DIM-1; lanes 0..INPUT_DIM-1 stay exactly zero so ReLU
    # produces exact zeros there (lets the kernel do one dense store).
    w3p = jnp.zeros((HIDDEN, OUT_DIM), jnp.float32).at[:, INPUT_DIM:].set(w3t)
    b3p = jnp.zeros((OUT_DIM,), jnp.float32).at[INPUT_DIM:].set(b3)

    # Pack w1 + all biases into one (16,128) buffer; stack w2/w3p into one buffer.
    wpack = jnp.zeros((WPACK_ROWS, HIDDEN), jnp.float32)
    wpack = wpack.at[:INPUT_DIM, :].set(w1t)
    wpack = wpack.at[INPUT_DIM, :].set(b1)
    wpack = wpack.at[INPUT_DIM + 1, :].set(b2)
    wpack = wpack.at[INPUT_DIM + 2, :].set(b3p)
    w23 = jnp.stack([w2t, w3p], axis=0)         # (2, HIDDEN, OUT_DIM)

    kernel_params = (wpack, w23)
    ref_params = (w1t, b1, w2t, b2, w3t, b3)    # unpacked, for the pure-JAX reference
    return kernel_params, ref_params


def lls_reference(x, ref_params):
    """Pure-JAX reference matching the PyTorch forward (same SN'd weights)."""
    w1t, b1, w2t, b2, w3t, b3 = ref_params
    h1 = jax.nn.relu(x @ w1t + b1)
    h2 = jax.nn.relu(h1 @ w2t + b2)
    e = jax.nn.relu(h2 @ w3t + b3)
    return jnp.concatenate([x, e], axis=-1)


if __name__ == "__main__":
    key = jax.random.PRNGKey(0)
    kx, kp = jax.random.split(key, 2)
    BATCH = 16
    x = jax.random.normal(kx, (BATCH, INPUT_DIM), jnp.float32)
    kernel_params, ref_params = make_params(kp)

    out = jax.block_until_ready(lls_no_decoder_forward(x, kernel_params))
    ref = jax.block_until_ready(lls_reference(x, ref_params))

    assert out.shape == (BATCH, OUT_DIM)
    assert jnp.allclose(out, ref, atol=1e-5, rtol=1e-5)
    print("KERNEL_OK")
</pallas_src>

<mosaic_0001>
module attributes {stable_mosaic.version = 11 : i64} {
  func.func @_lls_encode_kernel(%arg0: i32, %arg1: memref<16x8xf32, #tpu.memory_space<vmem>>, %arg2: memref<16x128xf32, #tpu.memory_space<vmem>>, %arg3: memref<2x128x128xf32, #tpu.memory_space<vmem>>, %arg4: memref<16x128xf32, #tpu.memory_space<vmem>>) attributes {dimension_semantics = [#tpu.dimension_semantics<parallel>], iteration_bounds = array<i64: 1>, scalar_prefetch = 0 : i64, scratch_operands = 0 : i64, tpu.core_type = #tpu.core_type<tc>, window_params = [{transform_indices = @transform_0, window_bounds = array<i64: 16, 8>}, {pipeline_mode = #tpu.pipeline_mode<synchronous>, transform_indices = @transform_1, window_bounds = array<i64: 16, 128>}, {pipeline_mode = #tpu.pipeline_mode<synchronous>, transform_indices = @transform_2, window_bounds = array<i64: 2, 128, 128>}, {transform_indices = @transform_3, window_bounds = array<i64: 16, 128>}]} {
    %c0 = arith.constant 0 : index
    %c0_0 = arith.constant 0 : index
    %0 = vector.load %arg1[%c0, %c0_0] : memref<16x8xf32, #tpu.memory_space<vmem>>, vector<16x8xf32>
    %c0_1 = arith.constant 0 : index
    %c0_2 = arith.constant 0 : index
    %1 = vector.load %arg2[%c0_1, %c0_2] : memref<16x128xf32, #tpu.memory_space<vmem>>, vector<8x128xf32>
    %c8 = arith.constant 8 : index
    %c0_3 = arith.constant 0 : index
    %2 = vector.load %arg2[%c8, %c0_3] : memref<16x128xf32, #tpu.memory_space<vmem>>, vector<1x128xf32>
    %c9 = arith.constant 9 : index
    %c0_4 = arith.constant 0 : index
    %3 = vector.load %arg2[%c9, %c0_4] : memref<16x128xf32, #tpu.memory_space<vmem>>, vector<1x128xf32>
    %c10 = arith.constant 10 : index
    %c0_5 = arith.constant 0 : index
    %4 = vector.load %arg2[%c10, %c0_5] : memref<16x128xf32, #tpu.memory_space<vmem>>, vector<1x128xf32>
    %c0_6 = arith.constant 0 : index
    %c0_7 = arith.constant 0 : index
    %c0_8 = arith.constant 0 : index
    %5 = vector.load %arg3[%c0_6, %c0_7, %c0_8] : memref<2x128x128xf32, #tpu.memory_space<vmem>>, vector<1x128x128xf32>
    %6 = vector.shape_cast %5 : vector<1x128x128xf32> to vector<128x128xf32>
    %c1 = arith.constant 1 : index
    %c0_9 = arith.constant 0 : index
    %c0_10 = arith.constant 0 : index
    %7 = vector.load %arg3[%c1, %c0_9, %c0_10] : memref<2x128x128xf32, #tpu.memory_space<vmem>>, vector<1x128x128xf32>
    %8 = vector.shape_cast %7 : vector<1x128x128xf32> to vector<128x128xf32>
    %cst = arith.constant dense<0.000000e+00> : vector<16x128xf32>
    %9 = tpu.matmul %0, %1, %cst {dimension_numbers = #tpu.dot_dimension_numbers<[1], [0], [0], [1], [0, 0, 1, 1], [], []>} : vector<16x8xf32>, vector<8x128xf32>, vector<16x128xf32> -> vector<16x128xf32>
    %10 = vector.broadcast %2 : vector<1x128xf32> to vector<16x128xf32>
    %11 = arith.addf %9, %10 : vector<16x128xf32>
    %cst_11 = arith.constant 0.000000e+00 : f32
    %12 = vector.broadcast %cst_11 : f32 to vector<16x128xf32>
    %13 = arith.maximumf %11, %12 : vector<16x128xf32>
    %cst_12 = arith.constant dense<0.000000e+00> : vector<16x128xf32>
    %14 = tpu.matmul %13, %6, %cst_12 {dimension_numbers = #tpu.dot_dimension_numbers<[1], [0], [0], [1], [0, 0, 1, 1], [], []>} : vector<16x128xf32>, vector<128x128xf32>, vector<16x128xf32> -> vector<16x128xf32>
    %15 = vector.broadcast %3 : vector<1x128xf32> to vector<16x128xf32>
    %16 = arith.addf %14, %15 : vector<16x128xf32>
    %cst_13 = arith.constant 0.000000e+00 : f32
    %17 = vector.broadcast %cst_13 : f32 to vector<16x128xf32>
    %18 = arith.maximumf %16, %17 : vector<16x128xf32>
    %cst_14 = arith.constant dense<0.000000e+00> : vector<16x128xf32>
    %19 = tpu.matmul %18, %8, %cst_14 {dimension_numbers = #tpu.dot_dimension_numbers<[1], [0], [0], [1], [0, 0, 1, 1], [], []>} : vector<16x128xf32>, vector<128x128xf32>, vector<16x128xf32> -> vector<16x128xf32>
    %20 = vector.broadcast %4 : vector<1x128xf32> to vector<16x128xf32>
    %21 = arith.addf %19, %20 : vector<16x128xf32>
    %cst_15 = arith.constant 0.000000e+00 : f32
    %22 = vector.broadcast %cst_15 : f32 to vector<16x128xf32>
    %23 = arith.maximumf %21, %22 : vector<16x128xf32>
    %cst_16 = arith.constant 0.000000e+00 : f32
    %24 = vector.broadcast %cst_16 : f32 to vector<16x120xf32>
    %25 = tpu.concatenate %0, %24 in 1 : vector<16x8xf32>, vector<16x120xf32> -> vector<16x128xf32>
    %26 = arith.addf %25, %23 : vector<16x128xf32>
    %c0_17 = arith.constant 0 : index
    %c0_18 = arith.constant 0 : index
    %27 = vector.load %arg4[%c0_17, %c0_18] : memref<16x128xf32, #tpu.memory_space<vmem>>, vector<16x128xf32>
    tpu.vector_store %arg4[%c0_17, %c0_18], %26 {strides = array<i32>} : memref<16x128xf32, #tpu.memory_space<vmem>>, vector<16x128xf32>,
    return
  }
  func.func @transform_0(%arg0: i32) -> (i32, i32) {
    %c0_i32 = arith.constant 0 : i32
    %c0_i32_0 = arith.constant 0 : i32
    return %arg0, %c0_i32 : i32, i32
  }
  func.func @transform_1(%arg0: i32) -> (i32, i32) {
    %c0_i32 = arith.constant 0 : i32
    %c0_i32_0 = arith.constant 0 : i32
    %c0_i32_1 = arith.constant 0 : i32
    return %c0_i32, %c0_i32_0 : i32, i32
  }
  func.func @transform_2(%arg0: i32) -> (i32, i32, i32) {
    %c0_i32 = arith.constant 0 : i32
    %c0_i32_0 = arith.constant 0 : i32
    %c0_i32_1 = arith.constant 0 : i32
    %c0_i32_2 = arith.constant 0 : i32
    return %c0_i32, %c0_i32_0, %c0_i32_1 : i32, i32, i32
  }
  func.func @transform_3(%arg0: i32) -> (i32, i32) {
    %c0_i32 = arith.constant 0 : i32
    %c0_i32_0 = arith.constant 0 : i32
    return %arg0, %c0_i32 : i32, i32
  }
}

</mosaic_0001>

<bundles_post_ra>
// kernel: tpu_custom_call.1
= control target key start
LH: loop header
LB: loop body
LE: loop exit
PB: predicated region body
PF: predicated region fallthrough
CT: control target
= control target key end

     0   :  { %8 = vsyncpa [#allocation3], 0  ;;  %s660_s0 = inlined_call_operand.vmem [shape: f32[16,8], index: 0, kind: input, shape index: {}]   ;;  %s661_s1 = inlined_call_operand.vmem [shape: f32[16,128], index: 1, kind: input, shape index: {}]   ;;  %s662_s2 = inlined_call_operand.hbm [shape: f32[2,128,128], index: 2, kind: input, shape index: {}]   ;;  %s663_s3 = inlined_call_operand.hbm [shape: f32[16,128], index: 3, kind: output, shape index: {}]  }
   0x1   :  { %9 = vsyncpa [#allocation4], 0  ;;  %s576_s12 = smov [#allocation2]   ;;  %s528_s16 = scalar_lea.hbm %s662_s2, 4096 }
   0x2   :  { %s19_s13 = sshll.u32 %s576_s12, 4  ;;  %p529_p0 = scmp.ne.s32.totalorder %s662_s2, %s528_s16  ;;  %s20_s13 = int_to_ptr.vmem [resolvable:$true] %s19_s13 }
   0x3   :  { %p532_p1 = scmp.lt.u32.totalorder %s528_s16, %s662_s2 }
   0x5   :  { %p534_p2 = pnand %p532_p1, %p529_p0 }
   0x7   :  { %537 = shalt.err (!%p534_p2)
}
   0x8   :  { %s538_s21 = scalar_lea.vmem %s20_s13, 4096  ;;  %p543_p4 = scmp.lt.s32.totalorder %s20_s13, %s20_s13 }
   0x9   :  { %p539_p3 = scmp.ne.s32.totalorder %s20_s13, %s538_s21  ;;  %p544_p5 = scmp.lt.s32.totalorder %s538_s21, %s538_s21 }
   0xb   :  { %p545_p6 = por %p544_p5, %p543_p4 }
   0xd   :  { %p546_p7 = pnand %p545_p6, %p539_p3 }
   0xf   :  { %549 = shalt.err (!%p546_p7)
}
  0x10   :  { %s577_s22 = smov 128   ;;  %s578_s23 = smov 8  }
  0x11   :  { %25 = dma.hbm_to_vmem [thread:$0]  %s662_s2, 4096, %s20_s13, [#allocation3], %s577_s22, %s577_s22, %s578_s23  }
  0x12   :  { %572 = dma.done.wait [#allocation3], 4096  }
  0x13   :  { %573 = vsyncadd [#allocation3], 4294963200  ;;  %vm72_vm0 = vcmask 64512   ;;  %v31_v0 = vld [vmem:[%s661_s1] sm:$0xff]  ;;  %v626_v2 = vld [vmem:[%s660_s0 + $0x8] sm:$0xff]  ;;  %s579_s9 = smov [#allocation5]  }
  0x14   :  { %v621_v1 = vld [vmem:[%s660_s0] sm:$0xff]  ;;  %385 = vmatprep.subr.mxu0 %v31_v0  ;;  %v36_v4 = vld [vmem:[#allocation2 + $0x8] sm:$0xff]  ;;  %v37_v5 = vld [vmem:[#allocation2 + $0x10] sm:$0xff]  ;;  %s329_s10 = sshll.u32 %s579_s9, 4  ;;  %s330_s10 = int_to_ptr.vmem [resolvable:$true] %s329_s10 }
  0x15   :  { %387 = vmatprep.mubr.msk.f32.mxu0 %vm72_vm0, %v621_v1  ;;  %v35_v3 = vld [vmem:[#allocation2] sm:$0xff]  ;;  %386 = vmatpush3.msra.mxu0 %v31_v0  ;;  %v38_v7 = vld [vmem:[#allocation2 + $0x18] sm:$0xff]  ;;  %v40_v10 = vld [vmem:[#allocation2 + $0x28] sm:$0xff]  ;;  %p555_p9 = scmp.lt.s32.totalorder %s330_s10, %s330_s10 }
  0x16   :  { %v460_v6 = vpack.c.bf16 %v36_v4, %v35_v3  ;;  %388 = vmatmul.mubr.msk.f32.vlgmr.msra.gmra.mrb[0].mxu0 %vm72_vm0, %v626_v2  ;;  %v464_v8 = vpack.c.bf16 %v38_v7, %v37_v5  ;;  %v39_v9 = vld [vmem:[#allocation2 + $0x20] sm:$0xff]  ;;  %v41_v12 = vld [vmem:[#allocation2 + $0x30] sm:$0xff]  ;;  %v42_v13 = vld [vmem:[#allocation2 + $0x38] sm:$0xff]  ;;  %v319_v7 = vsel %vm72_vm0, %v626_v2, 0.0 }
  0x17   :  { %v468_v11 = vpack.c.bf16 %v40_v10, %v39_v9  ;;  %v472_v14 = vpack.c.bf16 %v42_v13, %v41_v12  ;;  %v43_v15 = vld [vmem:[#allocation2 + $0x40] sm:$0xff]  ;;  %v44_v16 = vld [vmem:[#allocation2 + $0x48] sm:$0xff]  ;;  %v45_v18 = vld [vmem:[#allocation2 + $0x50] sm:$0xff]  ;;  %v318_v9 = vsel %vm72_vm0, %v621_v1, 0.0 }
  0x18   :  { %461 = vmatprep.subr.bf16.mxu1 %v460_v6  ;;  %v476_v17 = vpack.c.bf16 %v44_v16, %v43_v15  ;;  %v46_v19 = vld [vmem:[#allocation2 + $0x58] sm:$0xff]  ;;  %v47_v21 = vld [vmem:[#allocation2 + $0x60] sm:$0xff]  ;;  %v48_v22 = vld [vmem:[#allocation2 + $0x68] sm:$0xff] }
  0x19   :  { %463 = vmatpush3.bf16.msra.mxu1 %v460_v6  ;;  %v480_v20 = vpack.c.bf16 %v46_v19, %v45_v18  ;;  %v484_v23 = vpack.c.bf16 %v48_v22, %v47_v21  ;;  %v49_v24 = vld [vmem:[#allocation2 + $0x70] sm:$0xff]  ;;  %v50_v25 = vld [vmem:[#allocation2 + $0x78] sm:$0xff]  ;;  %v52_v27 = vld [vmem:[#allocation2 + $0x80] sm:$0xff] }
  0x1a   :  { %465 = vmatprep.subr.bf16.mxu1 %v464_v8  ;;  %v488_v26 = vpack.c.bf16 %v50_v25, %v49_v24  ;;  %v53_v28 = vld [vmem:[#allocation2 + $0x88] sm:$0xff]  ;;  %v54_v29 = vld [vmem:[#allocation2 + $0x90] sm:$0xff]  ;;  %v55_v31 = vld [vmem:[#allocation2 + $0x98] sm:$0xff] }
  0x1b   :  { %v492_v30 = vpack.c.bf16 %v53_v28, %v52_v27  ;;  %v496_v32 = vpack.c.bf16 %v55_v31, %v54_v29  ;;  %v56_v33 = vld [vmem:[#allocation2 + $0xa0] sm:$0xff]  ;;  %v57_v34 = vld [vmem:[#allocation2 + $0xa8] sm:$0xff]  ;;  %v58_v36 = vld [vmem:[#allocation2 + $0xb0] sm:$0xff] }
  0x1c   :  { %v500_v35 = vpack.c.bf16 %v57_v34, %v56_v33  ;;  %v59_v37 = vld [vmem:[#allocation2 + $0xb8] sm:$0xff]  ;;  %v60_v39 = vld [vmem:[#allocation2 + $0xc0] sm:$0xff]  ;;  %v61_v40 = vld [vmem:[#allocation2 + $0xc8] sm:$0xff] }
  0x1d   :  { %467 = vmatpush3.bf16.msra.mxu1 %v464_v8  ;;  %493 = vmatprep.subr.bf16.mxu0 %v492_v30  ;;  %v504_v38 = vpack.c.bf16 %v59_v37, %v58_v36  ;;  %v508_v41 = vpack.c.bf16 %v61_v40, %v60_v39  ;;  %v62_v42 = vld [vmem:[#allocation2 + $0xd0] sm:$0xff]  ;;  %v63_v43 = vld [vmem:[#allocation2 + $0xd8] sm:$0xff]  ;;  %v64_v45 = vld [vmem:[#allocation2 + $0xe0] sm:$0xff] }
  0x1e   :  { %469 = vmatprep.subr.bf16.mxu1 %v468_v11  ;;  %495 = vmatpush3.bf16.msra.mxu0 %v492_v30  ;;  %v512_v44 = vpack.c.bf16 %v63_v43, %v62_v42  ;;  %v65_v46 = vld [vmem:[#allocation2 + $0xe8] sm:$0xff]  ;;  %v66_v55 = vld [vmem:[#allocation2 + $0xf0] sm:$0xff]  ;;  %v67_v56 = vld [vmem:[#allocation2 + $0xf8] sm:$0xff] }
  0x1f   :  { %497 = vmatprep.subr.bf16.mxu0 %v496_v32  ;;  %v516_v47 = vpack.c.bf16 %v65_v46, %v64_v45  ;;  %v341_v48 = vld [vmem:[%s661_s1 + $0x8] ss:$0 sm:$0xff]  ;;  %v520_v57 = vpack.c.bf16 %v67_v56, %v66_v55  ;;  %v344_v58 = vld [vmem:[%s661_s1 + $0x9] ss:$0 sm:$0xff]  ;;  %v345_v3 = vld [vmem:[%s661_s1 + $0xa] ss:$0 sm:$0xff] }
  0x20   :  { %s550_s1 = scalar_lea.vmem %s330_s10, 256 }
  0x21   :  { %471 = vmatpush3.bf16.msra.mxu1 %v468_v11  ;;  %p551_p8 = scmp.ne.s32.totalorder %s330_s10, %s550_s1  ;;  %p556_p10 = scmp.lt.s32.totalorder %s550_s1, %s550_s1 }
  0x22   :  { %473 = vmatprep.subr.bf16.mxu1 %v472_v14  ;;  %499 = vmatpush3.bf16.msra.mxu0 %v496_v32 }
  0x23   :  { %501 = vmatprep.subr.bf16.mxu0 %v500_v35  ;;  %p557_p11 = por %p556_p10, %p555_p9 }
  0x25   :  { %475 = vmatpush3.bf16.msra.mxu1 %v472_v14  ;;  %p558_p12 = pnand %p557_p11, %p551_p8 }
  0x26   :  { %477 = vmatprep.subr.bf16.mxu1 %v476_v17  ;;  %503 = vmatpush3.bf16.msra.mxu0 %v500_v35 }
  0x27   :  { %505 = vmatprep.subr.bf16.mxu0 %v504_v38 }
  0x29   :  { %479 = vmatpush3.bf16.msra.mxu1 %v476_v17 }
  0x2a   :  { %481 = vmatprep.subr.bf16.mxu1 %v480_v20  ;;  %507 = vmatpush3.bf16.msra.mxu0 %v504_v38 }
  0x2b   :  { %509 = vmatprep.subr.bf16.mxu0 %v508_v41 }
  0x2d   :  { %483 = vmatpush3.bf16.msra.mxu1 %v480_v20 }
  0x2e   :  { %485 = vmatprep.subr.bf16.mxu1 %v484_v23  ;;  %511 = vmatpush3.bf16.msra.mxu0 %v508_v41 }
  0x2f   :  { %513 = vmatprep.subr.bf16.mxu0 %v512_v44 }
  0x31   :  { %487 = vmatpush3.bf16.msra.mxu1 %v484_v23 }
  0x32   :  { %489 = vmatprep.subr.bf16.mxu1 %v488_v26  ;;  %515 = vmatpush3.bf16.msra.mxu0 %v512_v44 }
  0x33   :  { %517 = vmatprep.subr.bf16.mxu0 %v516_v47 }
  0x35   :  { %491 = vmatpush3.bf16.msra.mxu1 %v488_v26 }
  0x36   :  { %519 = vmatpush3.bf16.msra.mxu0 %v516_v47 }
  0x37   :  { %521 = vmatprep.subr.bf16.mxu0 %v520_v57 }
  0x3a   :  { %523 = vmatpush3.bf16.msra.mxu0 %v520_v57 }
  0xe9   :  { %v389_v49 = vpop.f32.mrb[0].mxu0 }
  0xea   :  { %v151_v50 = vadd.f32 %v389_v49, %v341_v48  ;;  %v145_v51 = vpop.f32.mrb[1].mxu0 }
  0xeb   :  { %v146_v52 = vadd.f32 %v341_v48, %v145_v51 }
  0xec   :  { %v155_v54 = vmax.f32 %v151_v50, 0.0 }
  0xed   :  { %v154_v53 = vmax.f32 %v146_v52, 0.0 }
  0xef   :  { %422 = vmatprep.mubr.f32.mxu1 %v154_v53 }
  0xf0   :  { %423 = vmatmul.mubr.f32.vlgmr.msra.gmra.mrb[0].mxu1 %v155_v54 }
 0x1c3   :  { %v424_v59 = vpop.f32.mrb[0].mxu1 }
 0x1c4   :  { %v232_v60 = vadd.f32 %v424_v59, %v344_v58  ;;  %v226_v61 = vpop.f32.mrb[1].mxu1 }
 0x1c5   :  { %v227_v62 = vadd.f32 %v344_v58, %v226_v61 }
 0x1c6   :  { %v236_v0 = vmax.f32 %v232_v60, 0.0 }
 0x1c7   :  { %v235_v63 = vmax.f32 %v227_v62, 0.0 }
 0x1c9   :  { %457 = vmatprep.mubr.f32.mxu0 %v235_v63 }
 0x1ca   :  { %458 = vmatmul.mubr.f32.vlgmr.msra.gmra.mrb[2].mxu0 %v236_v0 }
 0x29d   :  { %v459_v4 = vpop.f32.mrb[2].mxu0 }
 0x29e   :  { %v313_v5 = vadd.f32 %v459_v4, %v345_v3  ;;  %v307_v6 = vpop.f32.mrb[3].mxu0 }
 0x29f   :  { %v308_v8 = vadd.f32 %v345_v3, %v307_v6 }
 0x2a0   :  { %v317_v10 = vmax.f32 %v313_v5, 0.0 }
 0x2a1   :  { %v316_v11 = vmax.f32 %v308_v8, 0.0 }
 0x2a2   :  { %v321_v12 = vadd.f32 %v319_v7, %v317_v10 }
 0x2a3   :  { %v320_v13 = vadd.f32 %v318_v9, %v316_v11 }
 0x2a4   :  { %323 = vst [vmem:[#allocation5 + $0x8] sm:$0xff] %v321_v12 }
 0x2a5   :  { %322 = vst [vmem:[#allocation5] sm:$0xff] %v320_v13 }
 0x2a6   :  { %561 = shalt.err (!%p558_p12)
}
 0x2a7   :  { %s562_s13 = scalar_lea.hbm %s663_s3, 256 }
 0x2a8   :  { %p563_p13 = scmp.ne.s32.totalorder %s663_s3, %s562_s13  ;;  %p566_p0 = scmp.lt.u32.totalorder %s562_s13, %s663_s3 }
 0x2aa   :  { %p568_p1 = pnand %p566_p0, %p563_p13 }
 0x2ac   :  { %571 = shalt.err (!%p568_p1)
}
 0x2ad   :  { %335 = dma.vmem_to_hbm [thread:$0]  %s330_s10, 256, %s663_s3, [#allocation4], %s577_s22, %s577_s22, %s578_s23  }
 0x2ae   :  { %574 = dma.done.wait [#allocation4], 256  }
 0x2af   :  { %575 = vsyncadd [#allocation4], 4294967040 }
 0x2b0   :  { %339 = vsyncpa [#allocation3], 1 }
 0x2b1   :  { %340 = vsyncpa [#allocation4], 1 }

</bundles_post_ra>
